<compile_context>
chip_gen: v5e
topology: v5e:2x2
jax: 0.10.0
libtpu: 0.0.40
codegen_flags: <defaults>
</compile_context>

<pallas_src>
import functools

import numpy as np
import jax
import jax.numpy as jnp
from jax.experimental import pallas as pl
from jax.experimental.pallas import tpu as pltpu

MIN_WEIGHT = 0.1
CONSISTENCY_NEIGH = 1  # 3x3 neighbourhood minus the centre pixel


def _round_up(x, m):
    return (x + m - 1) // m * m


def _positive_offsets(neigh):
    """Half of the neighbourhood; the other half is recovered by symmetry."""
    offs = []
    for oy in range(-neigh, neigh + 1):
        for ox in range(-neigh, neigh + 1):
            if (oy, ox) == (0, 0):
                continue
            if oy > 0 or (oy == 0 and ox > 0):
                offs.append((oy, ox))
    return offs


def _neighbor_weight_table(H, W, neigh, hw_pad):
    """(2K+1, hw_pad) f32 constant table, built at trace time.

    Row 2k   : border_mask(+oy,+ox) / divider  -> multiplies diff^2
    Row 2k+1 : border_mask(-oy,-ox) / divider  -> multiplies the reverse-rolled diff^2
    Row 2K   : pad mask (1 = real pixel, 0 = lane padding) -> used by the rescale sum
    Folding mask and 1/divider means the in-kernel consistency term is just
    1 - sum_k w_k * d2_k (no per-element divide/compare/iota), and the zero entries kill
    every roll wrap-around term, including wraps into the lane padding.
    """
    HW = H * W
    ii = np.arange(H)[:, None]
    jj = np.arange(W)[None, :]

    def valid(oy, ox):
        return (((ii - oy) >= 0) & ((ii - oy) < H) &
                ((jj - ox) >= 0) & ((jj - ox) < W)).astype(np.float32)

    div = np.zeros((H, W), np.float32)
    for oy in range(-neigh, neigh + 1):
        for ox in range(-neigh, neigh + 1):
            if (oy, ox) == (0, 0):
                continue
            div += valid(oy, ox)

    rows = []
    for (oy, ox) in _positive_offsets(neigh):
        rows.append((valid(oy, ox) / div).reshape(HW))
        rows.append((valid(-oy, -ox) / div).reshape(HW))
    rows.append(np.ones(HW, np.float32))           # pad mask
    tab = np.stack(rows, axis=0)                   # (2K+1, HW)
    if hw_pad != HW:
        tab = np.pad(tab, ((0, 0), (0, hw_pad - HW)))
    return tab


def _weight_kernel(nw_ref, yd_ref, ygt_ref, floor_ref, out_ref, *,
                   min_weight, shifts, hw_real, hw_pad):
    """One (TR, HWp) row-tile of WeightComputer.forward.

    nw_ref    : VMEM f32 (2K+1, HWp) -- folded mask/divider table + pad-mask row
    yd_ref    : VMEM f32 (TR, HWp)   -- predictions (probabilities, logits=False)
    ygt_ref   : VMEM f32 (TR, HWp)   -- ground truth
    floor_ref : VMEM f32 (TR, 1)     -- per-(n,c) float(not apply_weights[n])
    out_ref   : VMEM f32 (TR, HWp)   -- output weights
    """
    p = yd_ref[...]
    g = ygt_ref[...]

    # ---- _consistency (quadratic), symmetric-pair formulation on the flat lane axis.
    # d2[f] = (p[f] - p[f-s])^2 covers offset +s; rolling d2 by -s (== hw_pad - s) covers -s.
    # The constant table zeroes every wrap-around / out-of-border / pad-lane term.
    acc = jnp.zeros_like(p)
    for k, s in enumerate(shifts):
        d2 = jnp.square(p - pltpu.roll(p, s, 1))            # XLU roll, no VMEM block copies
        w_pos = nw_ref[pl.ds(2 * k, 1), :]                   # (1, HWp), sublane-broadcast
        w_neg = nw_ref[pl.ds(2 * k + 1, 1), :]
        acc = acc + w_pos * d2
        acc = acc + w_neg * pltpu.roll(d2, hw_pad - s, 1)
    consistency = 1.0 - acc

    # ---- _entropy (probability path): 1 + y*log2(y) + (1-y)*log2(1-y)
    # TODO(synk): p exactly at 0/1 gives NaN here (and poisons that channel's rescale sum),
    # matching torch.log2 in the reference module.
    inv_log2 = jnp.float32(1.4426950408889634)
    entropy = 1.0 + (p * jnp.log(p) + (1.0 - p) * jnp.log(1.0 - p)) * inv_log2

    # ---- pred_merged, max with gt, min_weight affine
    w = jnp.maximum(consistency * entropy, g)
    w = (1.0 - min_weight) * w + min_weight

    # ---- per-(n,c) spatial rescale: divide by mean == multiply by HW / (masked sum)
    if hw_pad != hw_real:
        pad_mask = nw_ref[pl.ds(2 * len(shifts), 1), :]      # (1, HWp)
        ssum = jnp.sum(w * pad_mask, axis=-1, keepdims=True)
    else:
        ssum = jnp.sum(w, axis=-1, keepdims=True)            # (TR, 1)
    w = w * (jnp.float32(hw_real) / ssum)                    # per-row scale, no per-elem div

    # ---- apply_weights: max(weights, float(not apply_weights[n]))
    w = jnp.maximum(w, floor_ref[...])

    out_ref[...] = w.astype(out_ref.dtype)


def _pick_row_tile(n_rows, hw_pad, bytes_budget=1 << 20, min_steps=8):
    """Rows per block: a multiple of 8 that divides n_rows, ~bytes_budget of f32 per block,
    shrunk (down to 8) when that exposes >= min_steps grid steps for megacore/pipelining."""
    tr = max(8, (bytes_budget // (hw_pad * 4)) // 8 * 8)
    tr = min(tr, n_rows)
    while tr > 8 and n_rows // tr < min_steps:
        tr -= 8
    while n_rows % tr != 0:
        tr -= 8
    return max(tr, 8)


def weight_computer(y_d, y_gt, apply_weights=None, *,
                    min_weight=MIN_WEIGHT, neigh=CONSISTENCY_NEIGH):
    """Pallas implementation of WeightComputer.forward (mode='pred_merged')."""
    N, C, H, W = y_d.shape
    HW = H * W
    HWp = _round_up(HW, 128)          # lane-dense, unmasked stores
    NC = N * C
    NCp = _round_up(NC, 8)            # native sublane multiple
    TR = _pick_row_tile(NCp, HWp)

    yd = y_d.reshape(NC, HW).astype(jnp.float32)
    ygt = y_gt.reshape(NC, HW).astype(jnp.float32)
    # TODO(synk): y_gt could travel as bf16/uint8 to cut HBM bytes on v5e/v6e when callers
    # guarantee exactly-representable ground truth; kept f32 for bit-faithful semantics.

    if apply_weights is None:
        floor_n = jnp.zeros((N,), jnp.float32)
    else:
        floor_n = (apply_weights.reshape(N) == 0).astype(jnp.float32)   # logical_not
    floor = jnp.broadcast_to(floor_n[:, None], (N, C)).reshape(NC, 1)

    if HWp != HW:
        # Pad value 0.5 keeps the entropy logs finite on pad lanes; the mask row excludes
        # them from the rescale sum and the wrapper slices them away.
        yd = jnp.pad(yd, ((0, 0), (0, HWp - HW)), constant_values=0.5)
        ygt = jnp.pad(ygt, ((0, 0), (0, HWp - HW)))
    if NCp != NC:
        yd = jnp.pad(yd, ((0, NCp - NC), (0, 0)), constant_values=0.5)
        ygt = jnp.pad(ygt, ((0, NCp - NC), (0, 0)))
        floor = jnp.pad(floor, ((0, NCp - NC), (0, 0)))

    nw_tab = jnp.asarray(_neighbor_weight_table(H, W, neigh, HWp))      # (2K+1, HWp)
    shifts = tuple(oy * W + ox for (oy, ox) in _positive_offsets(neigh))

    kernel = functools.partial(_weight_kernel, min_weight=float(min_weight),
                               shifts=shifts, hw_real=HW, hw_pad=HWp)

    grid_spec = pltpu.PrefetchScalarGridSpec(
        num_scalar_prefetch=0,
        grid=(NCp // TR,),
        in_specs=[
            pl.BlockSpec(nw_tab.shape, lambda r: (0, 0)),   # constant mask/div table
            pl.BlockSpec((TR, HWp), lambda r: (r, 0)),      # y_d
            pl.BlockSpec((TR, HWp), lambda r: (r, 0)),      # y_gt
            pl.BlockSpec((TR, 1), lambda r: (r, 0)),        # apply_weights floor column
        ],
        out_specs=pl.BlockSpec((TR, HWp), lambda r: (r, 0)),
    )
    n_elem = NCp * HWp
    out = pl.pallas_call(
        kernel,
        out_shape=jax.ShapeDtypeStruct((NCp, HWp), jnp.float32),
        grid_spec=grid_spec,
        compiler_params=pltpu.CompilerParams(
            dimension_semantics=("parallel",),
            vmem_limit_bytes=32 * 1024 * 1024),
        cost_estimate=pl.CostEstimate(
            flops=40 * n_elem,
            transcendentals=2 * n_elem,
            bytes_accessed=12 * n_elem),
    )(nw_tab, yd, ygt, floor)

    out = out[:NC, :HW]
    return out.reshape(N, C, H, W)


def weight_computer_ref(y_d, y_gt, apply_weights, *,
                        min_weight=MIN_WEIGHT, neigh=CONSISTENCY_NEIGH):
    """Pure-JAX reference mirroring the PyTorch forward pass exactly."""
    N, C, H, W = y_d.shape
    p = y_d
    acc = jnp.zeros_like(p)
    div = jnp.zeros_like(p)
    for oy in range(-neigh, neigh + 1):
        for ox in range(-neigh, neigh + 1):
            if ox == 0 and oy == 0:
                continue
            ry0, ry1 = max(0, oy), min(H, H + oy)
            rx0, rx1 = max(0, ox), min(W, W + ox)
            ty0, ty1 = max(0, -oy), min(H, H - oy)
            tx0, tx1 = max(0, -ox), min(W, W - ox)
            diff = jnp.square(p[:, :, ry0:ry1, rx0:rx1] - p[:, :, ty0:ty1, tx0:tx1])
            acc = acc.at[:, :, ry0:ry1, rx0:rx1].add(diff)
            div = div.at[:, :, ry0:ry1, rx0:rx1].add(1.0)
    consistency = 1.0 - acc / div
    entropy = 1.0 + y_d * jnp.log2(y_d) + (1.0 - y_d) * jnp.log2(1.0 - y_d)
    w = consistency * entropy
    w = jnp.maximum(w, y_gt)
    w = (1.0 - min_weight) * w + min_weight
    w = w / jnp.mean(w, axis=(2, 3), keepdims=True)
    not_aw = (1 - apply_weights.astype(jnp.int32)).astype(w.dtype)[:, None, None, None]
    return jnp.maximum(w, not_aw)


if __name__ == "__main__":
    key = jax.random.PRNGKey(0)
    k1, k2 = jax.random.split(key)

    N, C, H, W = 2, 4, 16, 16
    # predictions are probabilities in (0, 1); keep strictly inside for finite entropy
    y_d = jax.random.uniform(k1, (N, C, H, W), jnp.float32, minval=0.05, maxval=0.95)
    # binary ground-truth mask
    y_gt = (jax.random.uniform(k2, (N, C, H, W), jnp.float32) > 0.7).astype(jnp.float32)
    # per-batch apply mask (1 = apply computed weights, 0 = force weight >= 1)
    apply_weights = jnp.array([0, 1], dtype=jnp.int32)

    out = weight_computer(y_d, y_gt, apply_weights)
    out = jax.block_until_ready(out)

    ref = weight_computer_ref(y_d, y_gt, apply_weights)
    assert out.shape == (N, C, H, W)
    assert bool(jnp.all(jnp.isfinite(out))), "non-finite output"
    assert jnp.allclose(out, ref, rtol=1e-4, atol=1e-5), "mismatch vs reference"

    print("KERNEL_OK")
</pallas_src>

<mosaic_0001>
module attributes {stable_mosaic.version = 11 : i64} {
  func.func @_weight_kernel(%arg0: i32, %arg1: memref<9x256xf32, #tpu.memory_space<vmem>>, %arg2: memref<8x256xf32, #tpu.memory_space<vmem>>, %arg3: memref<8x256xf32, #tpu.memory_space<vmem>>, %arg4: memref<8x1xf32, #tpu.memory_space<vmem>>, %arg5: memref<8x256xf32, #tpu.memory_space<vmem>>) attributes {dimension_semantics = [#tpu.dimension_semantics<parallel>], iteration_bounds = array<i64: 1>, scalar_prefetch = 0 : i64, scratch_operands = 0 : i64, tpu.core_type = #tpu.core_type<tc>, window_params = [{pipeline_mode = #tpu.pipeline_mode<synchronous>, transform_indices = @transform_0, window_bounds = array<i64: 9, 256>}, {transform_indices = @transform_1, window_bounds = array<i64: 8, 256>}, {transform_indices = @transform_2, window_bounds = array<i64: 8, 256>}, {transform_indices = @transform_3, window_bounds = array<i64: 8, 1>}, {transform_indices = @transform_4, window_bounds = array<i64: 8, 256>}]} {
    %c0 = arith.constant 0 : index
    %c0_0 = arith.constant 0 : index
    %0 = vector.load %arg2[%c0, %c0_0] : memref<8x256xf32, #tpu.memory_space<vmem>>, vector<8x256xf32>
    %c0_1 = arith.constant 0 : index
    %c0_2 = arith.constant 0 : index
    %1 = vector.load %arg3[%c0_1, %c0_2] : memref<8x256xf32, #tpu.memory_space<vmem>>, vector<8x256xf32>
    %cst = arith.constant 0.000000e+00 : f32
    %2 = vector.broadcast %cst : f32 to vector<8x256xf32>
    %c1_i32 = arith.constant 1 : i32
    %3 = tpu.dynamic_rotate %0 by %c1_i32 dim 1 : vector<8x256xf32>, i32 -> vector<8x256xf32>
    %4 = arith.subf %0, %3 : vector<8x256xf32>
    %5 = arith.mulf %4, %4 : vector<8x256xf32>
    %c0_3 = arith.constant 0 : index
    %c0_4 = arith.constant 0 : index
    %6 = vector.load %arg1[%c0_3, %c0_4] : memref<9x256xf32, #tpu.memory_space<vmem>>, vector<1x256xf32>
    %c1 = arith.constant 1 : index
    %c0_5 = arith.constant 0 : index
    %7 = vector.load %arg1[%c1, %c0_5] : memref<9x256xf32, #tpu.memory_space<vmem>>, vector<1x256xf32>
    %8 = vector.broadcast %6 : vector<1x256xf32> to vector<8x256xf32>
    %9 = arith.mulf %8, %5 : vector<8x256xf32>
    %10 = arith.addf %2, %9 : vector<8x256xf32>
    %c255_i32 = arith.constant 255 : i32
    %11 = tpu.dynamic_rotate %5 by %c255_i32 dim 1 : vector<8x256xf32>, i32 -> vector<8x256xf32>
    %12 = vector.broadcast %7 : vector<1x256xf32> to vector<8x256xf32>
    %13 = arith.mulf %12, %11 : vector<8x256xf32>
    %14 = arith.addf %10, %13 : vector<8x256xf32>
    %c15_i32 = arith.constant 15 : i32
    %15 = tpu.dynamic_rotate %0 by %c15_i32 dim 1 : vector<8x256xf32>, i32 -> vector<8x256xf32>
    %16 = arith.subf %0, %15 : vector<8x256xf32>
    %17 = arith.mulf %16, %16 : vector<8x256xf32>
    %c2 = arith.constant 2 : index
    %c0_6 = arith.constant 0 : index
    %18 = vector.load %arg1[%c2, %c0_6] : memref<9x256xf32, #tpu.memory_space<vmem>>, vector<1x256xf32>
    %c3 = arith.constant 3 : index
    %c0_7 = arith.constant 0 : index
    %19 = vector.load %arg1[%c3, %c0_7] : memref<9x256xf32, #tpu.memory_space<vmem>>, vector<1x256xf32>
    %20 = vector.broadcast %18 : vector<1x256xf32> to vector<8x256xf32>
    %21 = arith.mulf %20, %17 : vector<8x256xf32>
    %22 = arith.addf %14, %21 : vector<8x256xf32>
    %c241_i32 = arith.constant 241 : i32
    %23 = tpu.dynamic_rotate %17 by %c241_i32 dim 1 : vector<8x256xf32>, i32 -> vector<8x256xf32>
    %24 = vector.broadcast %19 : vector<1x256xf32> to vector<8x256xf32>
    %25 = arith.mulf %24, %23 : vector<8x256xf32>
    %26 = arith.addf %22, %25 : vector<8x256xf32>
    %c16_i32 = arith.constant 16 : i32
    %27 = tpu.dynamic_rotate %0 by %c16_i32 dim 1 : vector<8x256xf32>, i32 -> vector<8x256xf32>
    %28 = arith.subf %0, %27 : vector<8x256xf32>
    %29 = arith.mulf %28, %28 : vector<8x256xf32>
    %c4 = arith.constant 4 : index
    %c0_8 = arith.constant 0 : index
    %30 = vector.load %arg1[%c4, %c0_8] : memref<9x256xf32, #tpu.memory_space<vmem>>, vector<1x256xf32>
    %c5 = arith.constant 5 : index
    %c0_9 = arith.constant 0 : index
    %31 = vector.load %arg1[%c5, %c0_9] : memref<9x256xf32, #tpu.memory_space<vmem>>, vector<1x256xf32>
    %32 = vector.broadcast %30 : vector<1x256xf32> to vector<8x256xf32>
    %33 = arith.mulf %32, %29 : vector<8x256xf32>
    %34 = arith.addf %26, %33 : vector<8x256xf32>
    %c240_i32 = arith.constant 240 : i32
    %35 = tpu.dynamic_rotate %29 by %c240_i32 dim 1 : vector<8x256xf32>, i32 -> vector<8x256xf32>
    %36 = vector.broadcast %31 : vector<1x256xf32> to vector<8x256xf32>
    %37 = arith.mulf %36, %35 : vector<8x256xf32>
    %38 = arith.addf %34, %37 : vector<8x256xf32>
    %c17_i32 = arith.constant 17 : i32
    %39 = tpu.dynamic_rotate %0 by %c17_i32 dim 1 : vector<8x256xf32>, i32 -> vector<8x256xf32>
    %40 = arith.subf %0, %39 : vector<8x256xf32>
    %41 = arith.mulf %40, %40 : vector<8x256xf32>
    %c6 = arith.constant 6 : index
    %c0_10 = arith.constant 0 : index
    %42 = vector.load %arg1[%c6, %c0_10] : memref<9x256xf32, #tpu.memory_space<vmem>>, vector<1x256xf32>
    %c7 = arith.constant 7 : index
    %c0_11 = arith.constant 0 : index
    %43 = vector.load %arg1[%c7, %c0_11] : memref<9x256xf32, #tpu.memory_space<vmem>>, vector<1x256xf32>
    %44 = vector.broadcast %42 : vector<1x256xf32> to vector<8x256xf32>
    %45 = arith.mulf %44, %41 : vector<8x256xf32>
    %46 = arith.addf %38, %45 : vector<8x256xf32>
    %c239_i32 = arith.constant 239 : i32
    %47 = tpu.dynamic_rotate %41 by %c239_i32 dim 1 : vector<8x256xf32>, i32 -> vector<8x256xf32>
    %48 = vector.broadcast %43 : vector<1x256xf32> to vector<8x256xf32>
    %49 = arith.mulf %48, %47 : vector<8x256xf32>
    %50 = arith.addf %46, %49 : vector<8x256xf32>
    %cst_12 = arith.constant 1.000000e+00 : f32
    %51 = vector.broadcast %cst_12 : f32 to vector<8x256xf32>
    %52 = arith.subf %51, %50 : vector<8x256xf32>
    %53 = math.log %0 : vector<8x256xf32>
    %54 = arith.mulf %0, %53 : vector<8x256xf32>
    %cst_13 = arith.constant 1.000000e+00 : f32
    %55 = vector.broadcast %cst_13 : f32 to vector<8x256xf32>
    %56 = arith.subf %55, %0 : vector<8x256xf32>
    %cst_14 = arith.constant 1.000000e+00 : f32
    %57 = vector.broadcast %cst_14 : f32 to vector<8x256xf32>
    %58 = arith.subf %57, %0 : vector<8x256xf32>
    %59 = math.log %58 : vector<8x256xf32>
    %60 = arith.mulf %56, %59 : vector<8x256xf32>
    %61 = arith.addf %54, %60 : vector<8x256xf32>
    %cst_15 = arith.constant 1.44269502 : f32
    %62 = vector.broadcast %cst_15 : f32 to vector<8x256xf32>
    %63 = arith.mulf %61, %62 : vector<8x256xf32>
    %cst_16 = arith.constant 1.000000e+00 : f32
    %64 = vector.broadcast %cst_16 : f32 to vector<8x256xf32>
    %65 = arith.addf %64, %63 : vector<8x256xf32>
    %66 = arith.mulf %52, %65 : vector<8x256xf32>
    %67 = arith.maximumf %66, %1 : vector<8x256xf32>
    %cst_17 = arith.constant 0.899999976 : f32
    %68 = vector.broadcast %cst_17 : f32 to vector<8x256xf32>
    %69 = arith.mulf %68, %67 : vector<8x256xf32>
    %cst_18 = arith.constant 1.000000e-01 : f32
    %70 = vector.broadcast %cst_18 : f32 to vector<8x256xf32>
    %71 = arith.addf %69, %70 : vector<8x256xf32>
    %cst_19 = arith.constant dense<0.000000e+00> : vector<8xf32>
    %72 = vector.multi_reduction <add>, %71, %cst_19 [1] : vector<8x256xf32> to vector<8xf32>
    %73 = vector.shape_cast %72 : vector<8xf32> to vector<8x1xf32>
    %cst_20 = arith.constant 2.560000e+02 : f32
    %74 = vector.broadcast %cst_20 : f32 to vector<8x1xf32>
    %75 = arith.divf %74, %73 : vector<8x1xf32>
    %76 = vector.broadcast %75 : vector<8x1xf32> to vector<8x256xf32>
    %77 = arith.mulf %71, %76 : vector<8x256xf32>
    %c0_21 = arith.constant 0 : index
    %c0_22 = arith.constant 0 : index
    %78 = vector.load %arg4[%c0_21, %c0_22] : memref<8x1xf32, #tpu.memory_space<vmem>>, vector<8x1xf32>
    %79 = vector.broadcast %78 : vector<8x1xf32> to vector<8x256xf32>
    %80 = arith.maximumf %77, %79 : vector<8x256xf32>
    %c0_23 = arith.constant 0 : index
    %c0_24 = arith.constant 0 : index
    %81 = vector.load %arg5[%c0_23, %c0_24] : memref<8x256xf32, #tpu.memory_space<vmem>>, vector<8x256xf32>
    tpu.vector_store %arg5[%c0_23, %c0_24], %80 {strides = array<i32>} : memref<8x256xf32, #tpu.memory_space<vmem>>, vector<8x256xf32>,
    return
  }
  func.func @transform_0(%arg0: i32) -> (i32, i32) {
    %c0_i32 = arith.constant 0 : i32
    %c0_i32_0 = arith.constant 0 : i32
    %c0_i32_1 = arith.constant 0 : i32
    return %c0_i32, %c0_i32_0 : i32, i32
  }
  func.func @transform_1(%arg0: i32) -> (i32, i32) {
    %c0_i32 = arith.constant 0 : i32
    %c0_i32_0 = arith.constant 0 : i32
    return %arg0, %c0_i32 : i32, i32
  }
  func.func @transform_2(%arg0: i32) -> (i32, i32) {
    %c0_i32 = arith.constant 0 : i32
    %c0_i32_0 = arith.constant 0 : i32
    return %arg0, %c0_i32 : i32, i32
  }
  func.func @transform_3(%arg0: i32) -> (i32, i32) {
    %c0_i32 = arith.constant 0 : i32
    %c0_i32_0 = arith.constant 0 : i32
    return %arg0, %c0_i32 : i32, i32
  }
  func.func @transform_4(%arg0: i32) -> (i32, i32) {
    %c0_i32 = arith.constant 0 : i32
    %c0_i32_0 = arith.constant 0 : i32
    return %arg0, %c0_i32 : i32, i32
  }
}

</mosaic_0001>

<bundles_post_ra>
// kernel: tpu_custom_call.1
= control target key start
LH: loop header
LB: loop body
LE: loop exit
PB: predicated region body
PF: predicated region fallthrough
CT: control target
= control target key end

     0   :  { %9 = vsyncpa [#allocation3], 0  ;;  %s558_s0 = inlined_call_operand.hbm [shape: f32[9,256], index: 0, kind: input, shape index: {}]   ;;  %s559_s1 = inlined_call_operand.hbm [shape: f32[8,256], index: 1, kind: input, shape index: {}]   ;;  %s560_s2 = inlined_call_operand.hbm [shape: f32[8,256], index: 2, kind: input, shape index: {}]   ;;  %s561_s3 = inlined_call_operand.vmem [shape: f32[8,1], index: 3, kind: input, shape index: {}]   ;;  %s562_s4 = inlined_call_operand.hbm [shape: f32[8,256], index: 4, kind: output, shape index: {}]  }
   0x1   :  { %10 = vsyncpa [#allocation6], 0  ;;  %s30_s17 = sshll.u32 %s559_s1, 4  ;;  %s31_s17 = int_to_ptr.hbm [resolvable:$true] %s30_s17 }
   0x2   :  { %11 = vsyncpa [#allocation4], 0  ;;  %s432_s18 = smov [#allocation5]   ;;  %s16_s22 = sshll.u32 %s558_s0, 4  ;;  %s17_s22 = int_to_ptr.hbm [resolvable:$true] %s16_s22 }
   0x3   :  { %s32_s19 = sshll.u32 %s432_s18, 4  ;;  %s433_s23 = smov [#allocation2]   ;;  %s33_s19 = int_to_ptr.vmem [resolvable:$true] %s32_s19 }
   0x4   :  { %35 = dma.hbm_to_vmem [thread:$0]  %s31_s17, 256, %s33_s19, [#allocation6]  }
   0x5   :  { %s18_s24 = sshll.u32 %s433_s23, 4  ;;  %s434_s25 = smov 256   ;;  %s19_s24 = int_to_ptr.vmem [resolvable:$true] %s18_s24 }
   0x6   :  { %s435_s26 = smov 16   ;;  %s41_s1 = sshll.u32 %s560_s2, 4  ;;  %s42_s1 = int_to_ptr.hbm [resolvable:$true] %s41_s1 }
   0x7   :  { %24 = dma.hbm_to_vmem [thread:$0]  %s17_s22, 512, %s19_s24, [#allocation3], %s434_s25, %s434_s25, %s435_s26  }
   0x8   :  { %s436_s29 = smov [#allocation7]  }
   0x9   :  { %s43_s30 = sshll.u32 %s436_s29, 4  ;;  %s44_s30 = int_to_ptr.vmem [resolvable:$true] %s43_s30 }
   0xa   :  { %46 = dma.hbm_to_vmem [thread:$0]  %s42_s1, 256, %s44_s30, [#allocation6]  }
   0xb   :  { %426 = dma.done.wait [#allocation3], 512  }
   0xc   :  { %427 = vsyncadd [#allocation3], 4294966784 }
   0xd   :  { %428 = dma.done.wait [#allocation6], 512  }
   0xe   :  { %429 = vsyncadd [#allocation6], 4294966784  ;;  %v480_v0 = vld [vmem:[#allocation5] sm:$0xff]  ;;  %s437_s0 = smov 15   ;;  %s438_s5 = smov 1   ;;  %v485_v1 = vld [vmem:[#allocation5 + $0x8] sm:$0xff]  ;;  %v69_v2 = vlaneseq }
   0xf   :  { %106 = vrot.lane.b32.xlu1 %v480_v0, %s437_s0  ;;  %65 = vrot.lane.b32.xlu0 %v480_v0, %s438_s5  ;;  %s439_s2 = smov 17   ;;  %s440_s6 = smov 113   ;;  %v234_v36 = vsub.f32 1.0, %v480_v0  ;;  %v235_v37 = vsub.f32 1.0, %v485_v1  ;;  %320 = vlog2.f32 %v480_v0 }
  0x10   :  { %146 = vrot.lane.b32.xlu2 %v480_v0, %s435_s26  ;;  %v492_v6 = vand.u32 127, %v69_v2  ;;  %s441_s7 = smov 127   ;;  %s442_s8 = smov 112   ;;  %v158_v38 = vld [vmem:[#allocation2 + $0x4] ss:$8 sm:$0x3]  ;;  %322 = vlog2.f32 %v485_v1 }
  0x11   :  { %s443_s9 = smov 111   ;;  %v118_v40 = vld [vmem:[#allocation2 + $0x2] ss:$8 sm:$0x3]  ;;  %324 = vlog2.f32 %v234_v36  ;;  %v162_v42 = vperm.slane %v158_v38, 0  ;;  %v163_v53 = vperm.slane %v158_v38, 1 }
  0x12   :  { %vm110_vm0 = vcmp.lt.s32.totalorder %v492_v6, 15  ;;  %vm71_vm1 = vcmp.lt.s32.totalorder %v492_v6, 1  ;;  %vm150_vm2 = vcmp.lt.s32.totalorder %v492_v6, 16  ;;  %vm190_vm3 = vcmp.lt.s32.totalorder %v492_v6, 17  ;;  %s293_s15 = sshll.u32 %s562_s4, 4  ;;  %s294_s15 = int_to_ptr.hbm [resolvable:$true] %s293_s15 }
  0x13   :  { %v78_v41 = vld [vmem:[#allocation2] ss:$8 sm:$0x3]  ;;  %v80_v43 = vld [vmem:[#allocation2 + $0x1] ss:$8 sm:$0x3]  ;;  %326 = vlog2.f32 %v235_v37 }
  0x14   :  { %v122_v44 = vperm.slane %v118_v40, 0  ;;  %v123_v45 = vperm.slane %v118_v40, 1  ;;  %v82_v46 = vperm.slane %v78_v41, 0  ;;  %v83_v47 = vperm.slane %v78_v41, 1 }
  0x15   :  { %v321_v48 = vpop.eup %320  ;;  %v120_v49 = vld [vmem:[#allocation2 + $0x3] ss:$8 sm:$0x3]  ;;  %vm94_vm4 = vcmp.lt.s32.totalorder %v492_v6, 127  ;;  %v98_v50 = vperm.slane %v80_v43, 0  ;;  %v99_v51 = vperm.slane %v80_v43, 1 }
  0x16   :  { %v323_v52 = vpop.eup %322  ;;  %vm134_vm5 = vcmp.lt.s32.totalorder %v492_v6, 113  ;;  %v138_v63 = vperm.slane %v120_v49, 0  ;;  %vm174_vm6 = vcmp.lt.s32.totalorder %v492_v6, 112  ;;  %vm214_vm7 = vcmp.lt.s32.totalorder %v492_v6, 111  ;;  %v64_v6 = vld [vmem:[#allocation7 + $0x8] sm:$0xff] }
  0x17   :  { %108 = vrot.lane.b32.xlu1 %v485_v1, %s437_s0  ;;  %67 = vrot.lane.b32.xlu0 %v485_v1, %s438_s5  ;;  %v325_v56 = vpop.eup %324 }
  0x18   :  { %148 = vrot.lane.b32.xlu2 %v485_v1, %s435_s26 }
  0x19   :  { %v327_v61 = vpop.eup %326 }
  0x1f   :  { %188 = vrot.lane.b32.xlu1 %v485_v1, %s439_s2  ;;  %186 = vrot.lane.b32.xlu0 %v480_v0, %s439_s2 }
  0x6a   :  { %v147_v3 = vpop.permute.xlu2 %146 }
  0x72   :  { %v149_v12 = vpop.permute.xlu2 %148 }
  0x73   :  { %v151_v19 = vsel %vm150_vm2, %v147_v3, %v149_v12  ;;  %v152_v20 = vsel %vm150_vm2, %v149_v12, %v147_v3 }
  0x74   :  { %v154_v22 = vsub.f32 %v485_v1, %v151_v19  ;;  %v153_v23 = vsub.f32 %v480_v0, %v152_v20  ;;  %v237_v19 = vmul.f32 0.6931472, %v325_v56  ;;  %v239_v20 = vmul.f32 0.6931472, %v327_v61 }
  0x76   :  { %v511_v27 = vmul.f32 %v154_v22, %v154_v22  ;;  %v155_v30 = vmul.f32 %v153_v23, %v153_v23  ;;  %v241_v41 = vmul.f32 %v239_v20, %v235_v37 }
  0x78   :  { %v166_v54 = vmul.f32 %v162_v42, %v155_v30 }
  0x81   :  { %v107_v4 = vpop.permute.xlu1 %106  ;;  %v66_v5 = vpop.permute.xlu0 %65 }
  0x89   :  { %v109_v7 = vpop.permute.xlu1 %108  ;;  %v68_v8 = vpop.permute.xlu0 %67 }
  0x8a   :  { %v112_v9 = vsel %vm110_vm0, %v109_v7, %v107_v4  ;;  %v72_v10 = vsel %vm71_vm1, %v66_v5, %v68_v8  ;;  %v73_v11 = vsel %vm71_vm1, %v68_v8, %v66_v5  ;;  %v111_v21 = vsel %vm110_vm0, %v107_v4, %v109_v7  ;;  %v198_v4 = vld [vmem:[#allocation2 + $0x6] ss:$8 sm:$0x3] }
  0x8b   :  { %v113_v13 = vsub.f32 %v480_v0, %v112_v9  ;;  %v74_v14 = vsub.f32 %v480_v0, %v73_v11  ;;  %v75_v15 = vsub.f32 %v485_v1, %v72_v10  ;;  %v114_v24 = vsub.f32 %v485_v1, %v111_v21  ;;  %v160_v10 = vld [vmem:[#allocation2 + $0x5] ss:$8 sm:$0x3] }
  0x8c   :  { %v139_v7 = vperm.slane %v120_v49, 1  ;;  %v276_v11 = vld [vmem:[%s561_s3] sm:$0xff]  ;;  %v167_v21 = vmul.f32 %v163_v53, %v511_v27  ;;  %v178_v22 = vperm.slane %v160_v10, 0  ;;  %v179_v23 = vperm.slane %v160_v10, 1  ;;  %s445_s3 = smov [#allocation8]  }
  0x8d   :  { %v115_v16 = vmul.f32 %v113_v13, %v113_v13  ;;  %v76_v17 = vmul.f32 %v74_v14, %v74_v14  ;;  %v502_v18 = vmul.f32 %v75_v15, %v75_v15  ;;  %v116_v31 = vmul.f32 %v114_v24, %v114_v24  ;;  %s291_s12 = sshll.u32 %s445_s3, 4  ;;  %s292_s12 = int_to_ptr.vmem [resolvable:$true] %s291_s12 }
  0x8e   :  { %v229_v14 = vmul.f32 0.6931472, %v321_v48  ;;  %v231_v15 = vmul.f32 0.6931472, %v323_v52 }
  0x8f   :  { %130 = vrot.lane.b32.xlu1 %v115_v16, %s440_s6  ;;  %90 = vrot.lane.b32.xlu2 %v76_v17, %s441_s7  ;;  %v126_v57 = vmul.f32 %v122_v44, %v115_v16  ;;  %v127_v58 = vmul.f32 %v123_v45, %v116_v31  ;;  %v86_v59 = vmul.f32 %v82_v46, %v76_v17  ;;  %v444_v16 = vmov 0  }
  0x90   :  { %92 = vrot.lane.b32.xlu0 %v502_v18, %s441_s7  ;;  %v87_v62 = vmul.f32 %v83_v47, %v502_v18  ;;  %318 = vset.pattern.permute.xlu2 %v444_v16 }
  0x91   :  { %v189_v25 = vpop.permute.xlu1 %188  ;;  %v187_v26 = vpop.permute.xlu0 %186  ;;  %319 = vset.pattern.permute.xlu0 %v444_v16 }
  0x92   :  { %v191_v28 = vsel %vm190_vm3, %v187_v26, %v189_v25  ;;  %v192_v29 = vsel %vm190_vm3, %v189_v25, %v187_v26 }
  0x93   :  { %v193_v32 = vsub.f32 %v480_v0, %v192_v29  ;;  %v194_v33 = vsub.f32 %v485_v1, %v191_v28  ;;  %v202_v29 = vperm.slane %v198_v4, 0 }
  0x95   :  { %v516_v34 = vmul.f32 %v193_v32, %v193_v32  ;;  %v518_v35 = vmul.f32 %v194_v33, %v194_v33  ;;  %v232_v32 = vmul.f32 %v229_v14, %v480_v0  ;;  %v233_v33 = vmul.f32 %v231_v15, %v485_v1 }
  0x97   :  { %172 = vrot.lane.b32.xlu1 %v511_v27, %s442_s8  ;;  %132 = vrot.lane.b32.xlu2 %v116_v31, %s440_s6  ;;  %v240_v27 = vmul.f32 %v237_v19, %v234_v36  ;;  %v206_v48 = vmul.f32 %v202_v29, %v516_v34  ;;  %v243_v1 = vadd.f32 %v241_v41, %v233_v33 }
  0x98   :  { %170 = vrot.lane.b32.xlu0 %v155_v30, %s442_s8  ;;  %v203_v30 = vperm.slane %v198_v4, 1 }
  0x9a   :  { %v207_v49 = vmul.f32 %v203_v30, %v518_v35 }
  0x9f   :  { %210 = vrot.lane.b32.xlu2 %v516_v34, %s443_s9 }
  0xa0   :  { %212 = vrot.lane.b32.xlu0 %v518_v35, %s443_s9 }
  0xa7   :  { %279 = vperm.xlu2 %318, %v276_v11  }
  0xe9   :  { %v91_v39 = vpop.permute.xlu2 %90 }
  0xf1   :  { %v133_v5 = vpop.permute.xlu2 %132 }
  0xf9   :  { %v211_v56 = vpop.permute.xlu2 %210 }
 0x101   :  { %v131_v55 = vpop.permute.xlu1 %130  ;;  %v280_v29 = vpop.permute.xlu2 %279 }
 0x102   :  { %v93_v60 = vpop.permute.xlu0 %92  ;;  %v135_v12 = vsel %vm134_vm5, %v131_v55, %v133_v5  ;;  %v136_v13 = vsel %vm134_vm5, %v133_v5, %v131_v55  ;;  %v63_v5 = vld [vmem:[#allocation7] sm:$0xff] }
 0x103   :  { %v95_v2 = vsel %vm94_vm4, %v91_v39, %v93_v60  ;;  %v96_v3 = vsel %vm94_vm4, %v93_v60, %v91_v39  ;;  %v142_v24 = vmul.f32 %v138_v63, %v135_v12  ;;  %v143_v25 = vmul.f32 %v139_v7, %v136_v13 }
 0x104   :  { %v102_v8 = vmul.f32 %v98_v50, %v95_v2  ;;  %v103_v9 = vmul.f32 %v99_v51, %v96_v3  ;;  %v200_v50 = vld [vmem:[#allocation2 + $0x7] ss:$8 sm:$0x3]  ;;  %v242_v51 = vadd.f32 %v240_v27, %v232_v32 }
 0x105   :  { %v218_v53 = vperm.slane %v200_v50, 0  ;;  %v219_v55 = vperm.slane %v200_v50, 1 }
 0x106   :  { %v104_v17 = vadd.f32 %v102_v8, %v86_v59  ;;  %v105_v18 = vadd.f32 %v103_v9, %v87_v62 }
 0x108   :  { %v128_v26 = vadd.f32 %v126_v57, %v104_v17  ;;  %v129_v28 = vadd.f32 %v127_v58, %v105_v18  ;;  %v244_v57 = vmul.f32 1.442695, %v242_v51  ;;  %v245_v58 = vmul.f32 1.442695, %v243_v1 }
 0x109   :  { %v173_v31 = vpop.permute.xlu1 %172 }
 0x10a   :  { %v144_v38 = vadd.f32 %v142_v24, %v128_v26  ;;  %v145_v39 = vadd.f32 %v143_v25, %v129_v28  ;;  %v171_v40 = vpop.permute.xlu0 %170  ;;  %v246_v63 = vadd.f32 1.0, %v244_v57  ;;  %v247_v2 = vadd.f32 1.0, %v245_v58 }
 0x10b   :  { %v175_v42 = vsel %vm174_vm6, %v171_v40, %v173_v31  ;;  %v176_v43 = vsel %vm174_vm6, %v173_v31, %v171_v40 }
 0x10c   :  { %v168_v44 = vadd.f32 %v166_v54, %v144_v38  ;;  %v169_v45 = vadd.f32 %v167_v21, %v145_v39  ;;  %v182_v46 = vmul.f32 %v178_v22, %v175_v42  ;;  %v183_v47 = vmul.f32 %v179_v23, %v176_v43 }
 0x10e   :  { %v184_v0 = vadd.f32 %v182_v46, %v168_v44  ;;  %v185_v36 = vadd.f32 %v183_v47, %v169_v45 }
 0x110   :  { %v208_v37 = vadd.f32 %v206_v48, %v184_v0  ;;  %v209_v52 = vadd.f32 %v207_v49, %v185_v36 }
 0x112   :  { %v213_v54 = vpop.permute.xlu0 %212 }
 0x113   :  { %v215_v59 = vsel %vm214_vm7, %v211_v56, %v213_v54  ;;  %v216_v60 = vsel %vm214_vm7, %v213_v54, %v211_v56 }
 0x114   :  { %v222_v34 = vmul.f32 %v218_v53, %v215_v59  ;;  %v223_v61 = vmul.f32 %v219_v55, %v216_v60 }
 0x116   :  { %v224_v35 = vadd.f32 %v222_v34, %v208_v37  ;;  %v225_v62 = vadd.f32 %v223_v61, %v209_v52 }
 0x118   :  { %v226_v3 = vsub.f32 1.0, %v224_v35  ;;  %v227_v4 = vsub.f32 1.0, %v225_v62 }
 0x11a   :  { %v248_v7 = vmul.f32 %v246_v63, %v226_v3  ;;  %v249_v8 = vmul.f32 %v247_v2, %v227_v4 }
 0x11c   :  { %v250_v9 = vmax.f32 %v248_v7, %v63_v5  ;;  %v251_v10 = vmax.f32 %v249_v8, %v64_v6 }
 0x11e   :  { %v252_v11 = vmul.f32 0.9, %v250_v9  ;;  %v253_v12 = vmul.f32 0.9, %v251_v10 }
 0x120   :  { %v254_v13 = vadd.f32 0.1, %v252_v11  ;;  %v255_v14 = vadd.f32 0.1, %v253_v12 }
 0x122   :  { %v256_v15 = vadd.f32 %v255_v14, %v254_v13 }
 0x124   :  { %257 = vadd.xlane.f32.xlu1 %v256_v15 }
 0x197   :  { %v258_v16 = vpop.xlane.xlu1 %257 }
 0x198   :  { %328 = vrcp.f32 %v258_v16  ;;  %v270_v20 = vand.u32 2147483648, %v258_v16  ;;  %v268_v22 = vand.u32 2147483647, %v258_v16  ;;  %vm264_vm9 = vweird.f32 %v258_v16 }
 0x19a   :  { %v271_v24 = vor.u32 1.1754944e-38, %v270_v20  ;;  %vm269_vm11 = vcmp.eq.f32.partialorder %v268_v22, 8.507059e+37 }
 0x19e   :  { %v329_v17 = vpop.eup %328 }
 0x19f   :  { %v260_v18 = vmul.f32 %v329_v17, %v258_v16  ;;  %vm265_vm8 = vweird.f32 %v329_v17 }
 0x1a0   :  { %vm266_vm10 = vmor %vm264_vm9, %vm265_vm8 }
 0x1a1   :  { %v261_v19 = vsub.f32 1.0, %v260_v18 }
 0x1a3   :  { %v262_v21 = vmul.f32 %v329_v17, %v261_v19 }
 0x1a5   :  { %v263_v23 = vadd.f32 %v329_v17, %v262_v21 }
 0x1a7   :  { %v267_v25 = vsel %vm266_vm10, %v329_v17, %v263_v23 }
 0x1a8   :  { %v272_v26 = vsel %vm269_vm11, %v271_v24, %v267_v25 }
 0x1a9   :  { %v273_v28 = vmul.f32 256.0, %v272_v26 }
 0x1ab   :  { %v274_v30 = vmul.f32 %v273_v28, %v254_v13  ;;  %v275_v31 = vmul.f32 %v273_v28, %v255_v14 }
 0x1ad   :  { %v282_v32 = vmax.f32 %v274_v30, %v280_v29  ;;  %v283_v33 = vmax.f32 %v275_v31, %v280_v29 }
 0x1af   :  { %284 = vst [vmem:[#allocation8] sm:$0xff] %v282_v32 }
 0x1b0   :  { %285 = vst [vmem:[#allocation8 + $0x8] sm:$0xff] %v283_v33 }
 0x1b1   :  { %296 = dma.vmem_to_hbm [thread:$0]  %s292_s12, 256, %s294_s15, [#allocation4]  }
 0x1b2   :  { %430 = dma.done.wait [#allocation4], 256  }
 0x1b3   :  { %431 = vsyncadd [#allocation4], 4294967040 }
 0x1b4   :  { %301 = vsyncpa [#allocation3], 1 }
 0x1b5   :  { %302 = vsyncpa [#allocation6], 1 }
 0x1b6   :  { %303 = vsyncpa [#allocation4], 1 }

</bundles_post_ra>
